<compile_context>
chip_gen: v7x
topology: tpu7x:2x2x1
jax: 0.10.0
libtpu: 0.0.40
codegen_flags: <defaults>
</compile_context>

<pallas_src>
import math

import jax
import jax.numpy as jnp
from jax.experimental import pallas as pl
from jax.experimental.pallas import tpu as pltpu


def _multi_len_attention_kernel(x_ref, w_ref, b_ref, o_ref, y_ref):
    # x_ref: (V, td)   values[b, :, d0:d0+td]   (resident across the head axis)
    # w_ref: (Q, V)    shared linear weight     (resident across the whole grid)
    # b_ref: (Q, 1)    shared linear bias (column vector, resident)
    # o_ref: (Q, td)   output tile for (batch b, head h) of the (B,H,Q,D) result
    # y_ref: (Q, td)   f32 VMEM cache: matmul done once per (b, d-tile)
    h = pl.program_id(2)

    @pl.when(h == 0)
    def _():
        y_ref[...] = (
            jnp.dot(w_ref[...], x_ref[...], preferred_element_type=jnp.float32)
            + b_ref[...]
        )

    # Every head writes the same cached tile straight into (B, H, Q, D).
    o_ref[...] = y_ref[...].astype(o_ref.dtype)


def multi_len_attention(values, weight, bias, num_heads):
    """values: (B, value_len, D); weight: (Q, V); bias: (Q,). Returns (B, H, Q, D)."""
    B, V, D = values.shape
    Q, Vw = weight.shape
    assert Vw == V

    itemsize = jnp.dtype(values.dtype).itemsize
    bias_col = bias.reshape(Q, 1)

    # ---- lane-tile over D, derived from a VMEM budget that is safe on v7x ----
    budget = 40 * 1024 * 1024  # ~40 MiB usable (v7x: 64 MiB physical minus headroom)

    def footprint(td):
        # double-buffered values tile + double-buffered out tile
        # + resident weight/bias + f32 scratch cache
        return (2 * V * td + 2 * Q * td + Q * V + Q) * itemsize + Q * td * 4

    td = D
    if footprint(D) > budget and D % 128 == 0:
        td = 128
        for cand in range(D - 128, 127, -128):
            if D % cand == 0 and footprint(cand) <= budget:
                td = cand
                break
    # TODO(synk): if D is huge and NOT a multiple of 128, pad D in the wrapper
    # instead of falling back to one full-D tile.

    grid = (B, D // td, num_heads)

    vmem_limit = int(min(48 * 1024 * 1024,
                         max(32 * 1024 * 1024, 2 * footprint(td))))

    cost = pl.CostEstimate(
        flops=2 * B * Q * V * D,  # matmul done once per batch / d-tile; heads reuse it
        transcendentals=0,
        bytes_accessed=(B * V * D + B * num_heads * Q * D + Q * V + Q) * itemsize,
    )

    return pl.pallas_call(
        _multi_len_attention_kernel,
        out_shape=jax.ShapeDtypeStruct((B, num_heads, Q, D), values.dtype),
        grid_spec=pltpu.PrefetchScalarGridSpec(
            num_scalar_prefetch=0,
            grid=grid,
            in_specs=[
                # values: batch dim squeezed; block index ignores h -> stays resident
                pl.BlockSpec((None, V, td), lambda b, j, h: (b, 0, j)),
                pl.BlockSpec((Q, V), lambda b, j, h: (0, 0)),   # weight: resident
                pl.BlockSpec((Q, 1), lambda b, j, h: (0, 0)),   # bias:   resident
            ],
            # Write (B, H, Q, D) directly -> no wrapper transpose / broadcast passes.
            out_specs=pl.BlockSpec((None, None, Q, td), lambda b, j, h: (b, h, 0, j)),
            scratch_shapes=[pltpu.VMEM((Q, td), jnp.float32)],
        ),
        compiler_params=pltpu.CompilerParams(
            # batch / d-tile axes parallel (megacore on v7x); head axis carries
            # the scratch cache so it must be "arbitrary".
            dimension_semantics=("parallel", "parallel", "arbitrary"),
            vmem_limit_bytes=vmem_limit,
        ),
        cost_estimate=cost,
    )(values, weight, bias_col)


def reference_multi_len_attention(values, weight, bias, num_heads):
    # Pure-JAX reference mirroring the PyTorch forward exactly.
    x = jnp.transpose(values, (0, 2, 1))                     # (B, D, V)
    y = jnp.einsum("bdv,qv->bdq", x, weight) + bias          # (B, D, Q)
    y = jnp.broadcast_to(y[:, None], (values.shape[0], num_heads) + y.shape[1:])
    return jnp.transpose(y, (0, 1, 3, 2))                    # (B, H, Q, D)


if __name__ == "__main__":
    # Small shapes consistent with the module.
    B = 2           # batch
    num_heads = 4
    value_len = 16  # V (input dim of the Linear)
    query_len = 8   # Q (output dim of the Linear)
    D = 32          # feature dim carried through the permutes

    key = jax.random.PRNGKey(0)
    k_x, k_w, k_b = jax.random.split(key, 3)

    values = jax.random.normal(k_x, (B, value_len, D), dtype=jnp.float32)

    # Deterministic init mirroring nn.Linear default (uniform in +/- 1/sqrt(fan_in)).
    bound = 1.0 / math.sqrt(value_len)
    weight = jax.random.uniform(k_w, (query_len, value_len), jnp.float32, -bound, bound)
    bias = jax.random.uniform(k_b, (query_len,), jnp.float32, -bound, bound)

    out = multi_len_attention(values, weight, bias, num_heads)
    out = jax.block_until_ready(out)

    ref = reference_multi_len_attention(values, weight, bias, num_heads)
    assert out.shape == (B, num_heads, query_len, D), out.shape
    assert jnp.allclose(out, ref, atol=1e-5, rtol=1e-5), float(jnp.max(jnp.abs(out - ref)))

    print("KERNEL_OK")
</pallas_src>

<mosaic_0001>
module attributes {stable_mosaic.version = 11 : i64} {
  func.func @_multi_len_attention_kernel(%arg0: i32, %arg1: i32, %arg2: i32, %arg3: memref<1x16x32xf32, #tpu.memory_space<vmem>>, %arg4: memref<8x16xf32, #tpu.memory_space<vmem>>, %arg5: memref<8x1xf32, #tpu.memory_space<vmem>>, %arg6: memref<1x1x8x32xf32, #tpu.memory_space<vmem>>, %arg7: memref<8x32xf32, #tpu.memory_space<vmem>>) attributes {dimension_semantics = [#tpu.dimension_semantics<parallel>, #tpu.dimension_semantics<parallel>, #tpu.dimension_semantics<arbitrary>], iteration_bounds = array<i64: 2, 1, 4>, scalar_prefetch = 0 : i64, scratch_operands = 1 : i64, tpu.core_type = #tpu.core_type<tc>, window_params = [{transform_indices = @transform_0, window_bounds = array<i64: 1, 16, 32>}, {pipeline_mode = #tpu.pipeline_mode<synchronous>, transform_indices = @transform_1, window_bounds = array<i64: 8, 16>}, {pipeline_mode = #tpu.pipeline_mode<synchronous>, transform_indices = @transform_2, window_bounds = array<i64: 8, 1>}, {transform_indices = @transform_3, window_bounds = array<i64: 1, 1, 8, 32>}]} {
    %c0_i32 = arith.constant 0 : i32
    %0 = arith.cmpi eq, %arg2, %c0_i32 : i32
    %1 = arith.extui %0 : i1 to i32
    %c0_i32_0 = arith.constant 0 : i32
    %2 = arith.cmpi ne, %1, %c0_i32_0 : i32
    scf.if %2 {
      %c0_6 = arith.constant 0 : index
      %c0_7 = arith.constant 0 : index
      %7 = vector.load %arg4[%c0_6, %c0_7] : memref<8x16xf32, #tpu.memory_space<vmem>>, vector<8x16xf32>
      %c0_8 = arith.constant 0 : index
      %c0_9 = arith.constant 0 : index
      %c0_10 = arith.constant 0 : index
      %8 = vector.load %arg3[%c0_8, %c0_9, %c0_10] : memref<1x16x32xf32, #tpu.memory_space<vmem>>, vector<1x16x32xf32>
      %9 = vector.shape_cast %8 : vector<1x16x32xf32> to vector<16x32xf32>
      %cst = arith.constant dense<0.000000e+00> : vector<8x32xf32>
      %10 = tpu.matmul %7, %9, %cst {dimension_numbers = #tpu.dot_dimension_numbers<[1], [0], [0], [1], [0, 0, 1, 1], [], []>} : vector<8x16xf32>, vector<16x32xf32>, vector<8x32xf32> -> vector<8x32xf32>
      %c0_11 = arith.constant 0 : index
      %c0_12 = arith.constant 0 : index
      %11 = vector.load %arg5[%c0_11, %c0_12] : memref<8x1xf32, #tpu.memory_space<vmem>>, vector<8x1xf32>
      %12 = vector.broadcast %11 : vector<8x1xf32> to vector<8x32xf32>
      %13 = arith.addf %10, %12 : vector<8x32xf32>
      %c0_13 = arith.constant 0 : index
      %c0_14 = arith.constant 0 : index
      %14 = vector.load %arg7[%c0_13, %c0_14] : memref<8x32xf32, #tpu.memory_space<vmem>>, vector<8x32xf32>
      tpu.vector_store %arg7[%c0_13, %c0_14], %13 {strides = array<i32>} : memref<8x32xf32, #tpu.memory_space<vmem>>, vector<8x32xf32>,
    } else {
    }
    %c0 = arith.constant 0 : index
    %c0_1 = arith.constant 0 : index
    %3 = vector.load %arg7[%c0, %c0_1] : memref<8x32xf32, #tpu.memory_space<vmem>>, vector<8x32xf32>
    %c0_2 = arith.constant 0 : index
    %c0_3 = arith.constant 0 : index
    %c0_4 = arith.constant 0 : index
    %c0_5 = arith.constant 0 : index
    %4 = vector.load %arg6[%c0_2, %c0_3, %c0_4, %c0_5] : memref<1x1x8x32xf32, #tpu.memory_space<vmem>>, vector<1x1x8x32xf32>
    %5 = vector.shape_cast %4 : vector<1x1x8x32xf32> to vector<8x32xf32>
    %6 = vector.shape_cast %3 : vector<8x32xf32> to vector<1x1x8x32xf32>
    tpu.vector_store %arg6[%c0_2, %c0_3, %c0_4, %c0_5], %6 {strides = array<i32>} : memref<1x1x8x32xf32, #tpu.memory_space<vmem>>, vector<1x1x8x32xf32>,
    return
  }
  func.func @transform_0(%arg0: i32, %arg1: i32, %arg2: i32) -> (i32, i32, i32) {
    %c0_i32 = arith.constant 0 : i32
    %c0_i32_0 = arith.constant 0 : i32
    return %arg0, %c0_i32, %arg1 : i32, i32, i32
  }
  func.func @transform_1(%arg0: i32, %arg1: i32, %arg2: i32) -> (i32, i32) {
    %c0_i32 = arith.constant 0 : i32
    %c0_i32_0 = arith.constant 0 : i32
    %c0_i32_1 = arith.constant 0 : i32
    return %c0_i32, %c0_i32_0 : i32, i32
  }
  func.func @transform_2(%arg0: i32, %arg1: i32, %arg2: i32) -> (i32, i32) {
    %c0_i32 = arith.constant 0 : i32
    %c0_i32_0 = arith.constant 0 : i32
    %c0_i32_1 = arith.constant 0 : i32
    return %c0_i32, %c0_i32_0 : i32, i32
  }
  func.func @transform_3(%arg0: i32, %arg1: i32, %arg2: i32) -> (i32, i32, i32, i32) {
    %c0_i32 = arith.constant 0 : i32
    %c0_i32_0 = arith.constant 0 : i32
    return %arg0, %arg2, %c0_i32, %arg1 : i32, i32, i32, i32
  }
}

</mosaic_0001>

<bundles_post_ra>
// kernel: tpu_custom_call.1
= control target key start
LH: loop header
LB: loop body
LE: loop exit
PB: predicated region body
PF: predicated region fallthrough
CT: control target
= control target key end

     0   :  { %8 = vsyncpa [#allocation4], 0  ;;  %s965_s0 = inlined_call_operand.hbm [shape: f32[2,16,32], index: 0, kind: input, shape index: {}]   ;;  %s966_s1 = inlined_call_operand.vmem [shape: f32[8,16], index: 1, kind: input, shape index: {}]   ;;  %s967_s2 = inlined_call_operand.vmem [shape: f32[8,1], index: 2, kind: input, shape index: {}]   ;;  %s968_s3 = inlined_call_operand.hbm [shape: f32[2,4,8,32], index: 3, kind: output, shape index: {}]  }
   0x1   :  { %10 = vsyncpa [#allocation4 + $0x1], 0 }
   0x2   :  { %11 = vsyncpa [#allocation5], 0 }
   0x3   :  { %13 = vsyncpa [#allocation5 + $0x1], 0  ;;  %s735_s12 = smov 0   ;;  %s737_s13 = smov 0  }
   0x4   :  { %s739_s14 = smov 0   ;;  %s741_s15 = smov 0  }
   0x5   :  { %s743_s16 = smov 0   ;;  %s745_s17 = smov 0  }
   0x6   :  { %s747_s18 = smov 0   ;;  %s749_s19 = smov 0  }
   0x7   :  { %s751_s20 = smov 0   ;;  %s753_s21 = smov 0  }
   0x8   :  { %s755_s22 = smov 0  }
   0x9 LB: > { %s413_s23 = sadd.s32 4294967295, %s705_s22   ;;  %s414_s24 = sadd.s32 4294967294, %s705_s22   ;;  %s705_s22 = sphi %s755_s22, %s19_s22   ;;  %s701_s21 = sphi %s753_s21, %s990_s21   ;;  %s697_s20 = sphi %s751_s20, %s989_s20   ;;  %s693_s19 = sphi %s749_s19, %s988_s19   ;;  %s689_s18 = sphi %s747_s18, %s987_s18   ;;  %s685_s17 = sphi %s745_s17, %s986_s17   ;;  %s681_s16 = sphi %s743_s16, %s985_s16   ;;  %s677_s15 = sphi %s741_s15, %s984_s15   ;;  %s673_s14 = sphi %s739_s14, %s983_s14   ;;  %s669_s13 = sphi %s737_s13, %s982_s13   ;;  %s665_s12 = sphi %s735_s12, %s981_s12  }
   0xa   : > { %s31_s25 = sadd.s32 1, %s697_s20  ;;  %s38_s26 = sadd.s32 1, %s701_s21 }
   0xb   : > { %p32_p0 = scmp.ge.s32.totalorder %s31_s25, 4  ;;  %s47_s27 = sadd.s32 1, %s685_s17 }
   0xc   : > { %p54_p1 = scmp.ne.s32.totalorder %s685_s17, %s681_s16  ;;  %p55_p2 = scmp.eq.s32.totalorder %s705_s22, 0 }
   0xd   : > { %s992_s25 = smov (%p32_p0, %s31_s25), 0  ;;  %s994_s26 = smov (!%p32_p0, %s38_s26), %s701_s21 }
   0xe   : > { %p799_p3 = por %p55_p2, %p54_p1  ;;  %p60_p4 = scmp.ne.s32.totalorder %s681_s16, %s677_s15 }
   0xf   : > { %p40_p5 = scmp.ge.s32.totalorder %s994_s26, 2  ;;  %p61_p6 = scmp.eq.s32.totalorder %s413_s23, 0 }
  0x10   : > { %s113_s29 = ssub.s32 %s697_s20, %s992_s25  ;;  %s119_s30 = sadd.s32 1, %s673_s14 }
  0x11   : > { %s996_s26 = smov (%p40_p5, %s994_s26), 0  ;;  %p809_p7 = por %p61_p6, %p60_p4 }
  0x12   : > { %972 = sst [smem:[#allocation9_spill]] %s996_s26  ;;  %p129_p8 = scmp.ne.s32.totalorder %s673_s14, %s669_s13 }
  0x13   : > { %s42_s5 = ssub.s32 %s701_s21, %s996_s26  ;;  %p130_p9 = scmp.eq.s32.totalorder %s413_s23, 7 }
  0x14   : > { %p45_p10 = scmp.eq.s32.totalorder %s42_s5, 0  ;;  %s114_s6 = sor.u32 %s113_s29, %s42_s5 }
  0x15   : > { %p117_p11 = scmp.eq.s32.totalorder %s114_s6, 0  ;;  %p817_p12 = por %p130_p9, %p129_p8 }
  0x16   : > { %s822_s8 = scalar_select %p45_p10, %s685_s17, %s47_s27  }
  0x17   : > { %s974_s7 = scalar_select %p817_p12, 1, 0 }
  0x18   : > { %s825_s9 = scalar_select %p117_p11, %s673_s14, %s119_s30  }
  0x19   : > { %p135_p13 = scmp.ne.s32.totalorder %s669_s13, %s665_s12  ;;  %p136_p0 = scmp.eq.s32.totalorder %s414_s24, 7 }
  0x1a   : > { %p456_p1 = scmp.lt.s32.totalorder %s705_s22, 8  ;;  %s162_s11 = sand.u32 1, %s685_s17  }
  0x1b   : > { %p830_p2 = por %p136_p0, %p135_p13  ;;  %s417_s15 = sshll.u32 %s162_s11, 4 }
  0x1c   : > { %s430_s23 = sshll.u32 %s701_s21, 8  ;;  %s166_s27 = scalar_lea.vmem [#allocation3], %s417_s15 }
  0x1d   : > { %s975_s10 = scalar_select %p830_p2, 1, 0 }
  0x1e   : > { %s839_s6 = scalar_lea.hbm %s965_s0, %s430_s23  ;;  %s174_s30 = sshll.u32 %s166_s27, 4  ;;  %s841_s30 = int_to_ptr.vmem [resolvable:$true] %s174_s30 }
  0x1f   : > { %p845_p4 = pnand %p456_p1, %p799_p3  ;;  %s850_s26 = scalar_lea.sflag [#allocation4], %s162_s11 }
  0x20   : > { %s553_s23 = scalar_lea.hbm %s839_s6, 256  ;;  %s558_s28 = scalar_lea.hbm %s965_s0, 512 }
  0x21   : > { %p554_p6 = scmp.ne.s32.totalorder %s839_s6, %s553_s23  ;;  %p555_p8 = pneg %p845_p4 }
  0x22   : > { %p559_p3 = scmp.lt.u32.totalorder %s839_s6, %s965_s0  ;;  %p560_p11 = scmp.lt.u32.totalorder %s558_s28, %s553_s23 }
  0x23   : > { %p556_p9 = pnand %p555_p8, %p554_p6  ;;  %p562_p0 = scmp.lt.u32.totalorder %s553_s23, %s839_s6 }
  0x24   : > { %p561_p13 = por %p560_p11, %p559_p3 }
  0x25   : > { %p557_p10 = pneg %p556_p9 }
  0x26   : > { %p563_p1 = por %p562_p0, %p561_p13 }
  0x28   : > { %p564_p5 = pnand %p563_p1, %p557_p10 }
  0x2a   : > { %567 = shalt.err (!%p564_p5)
}
  0x2b   : > { %s568_s11 = scalar_lea.vmem %s841_s30, 256  ;;  %s707_s15 = smov [#allocation3]  }
  0x2c   : > { %p569_p6 = scmp.ne.s32.totalorder %s841_s30, %s568_s11  ;;  %s573_s29 = sshll.u32 %s707_s15, 4  ;;  %s574_s29 = int_to_ptr.vmem [resolvable:$false] %s573_s29 }
  0x2d   : > { %s575_s5 = scalar_lea.vmem %s574_s29, 512  ;;  %p576_p12 = scmp.lt.s32.totalorder %s841_s30, %s574_s29 }
  0x2e   : > { %p571_p9 = pnand %p569_p6, %p555_p8  ;;  %p577_p3 = scmp.lt.s32.totalorder %s575_s5, %s568_s11 }
  0x30   : > { %p572_p2 = pneg %p571_p9  ;;  %p578_p11 = por %p577_p3, %p576_p12 }
  0x32   : > { %p579_p13 = pnand %p578_p11, %p572_p2 }
  0x34   : > { %582 = shalt.err (!%p579_p13)
}
  0x35   : > { %s708_s23 = smov 128   ;;  %s709_s28 = smov 8  }
  0x36   : > { %451 = dma.hbm_to_vmem [thread:$0]  (!%p845_p4), %s839_s6, 256, %s841_s30, %s850_s26, %s708_s23, %s708_s23, %s709_s28  }
  0x37   : > { %p182_p5 = scmp.lt.s32.totalorder %s705_s22, 9  ;;  %p977_p8 = scmp.ge.s32.totalorder %s705_s22, 1 }
  0x39   : > { %p183_p10 = pnand %p977_p8, %p182_p5 }
  0x3a   : > { %s188_s27 = sand.u32 (!%p183_p10), 1, %s681_s16  }
  0x3b   : > { %186 = sbr.rel (%p183_p10) target bundleno = 315 (0x13b), region = 32  ;;  %s421_s11 = sshll.u32 (!%p183_p10), %s188_s27, 4 }
  0x3c   : > { %s189_s15 = scalar_lea.sflag (!%p183_p10), [#allocation4], %s188_s27  ;;  %s192_s29 = scalar_lea.vmem (!%p183_p10), [#allocation3], %s421_s11 }
  0x42   : > { %656 = dma.done.wait (%p809_p7), %s189_s15, 256  }
  0x43   : > { %658 = vsyncadd (%p809_p7), %s189_s15, 4294967040  ;;  %s212_s5 = sand.u32 1, %s669_s13   ;;  %p423_p12 = scmp.ne.s32.totalorder %s689_s18, 0 }
  0x44   : > { %s889_s26 = sshll.u32 %s212_s5, 3  ;;  %v220_v0 = vld [vmem:[%s192_s29] sm:$0xff] (!%p423_p12)  ;;  %v221_v1 = vld [vmem:[%s192_s29 + $0x8] sm:$0xff] (!%p423_p12)  ;;  %v710_v2 = vmov (!%p423_p12), 0.0|0.0   ;;  %vm711_vm0 = vmmov (!%p423_p12), 0   ;;  %v712_v4 = vmov (!%p423_p12), 0.0  }
  0x45   : > { %s214_s6 = scalar_lea.vmem [#allocation6], %s889_s26  ;;  %218 = sbr.rel (%p423_p12) target bundleno = 289 (0x121), region = 40  ;;  %441 = vmatprep.subr.bf16.mxu0 (!%p423_p12), %v710_v2  ;;  %v442_v3 = vpack.c.bf16 (!%p423_p12), %v221_v1, %v220_v0  ;;  %438 = vmatprep.mubr.msk.f32.mxu0 (!%p423_p12), %vm711_vm0, %v712_v4  ;;  %v222_v5 = vld [vmem:[%s967_s2] sm:$0xff] (!%p423_p12)  ;;  %v713_v6 = vmov (!%p423_p12), 0   ;;  %vm228_vm1 = vcmask (!%p423_p12), 130048   ;;  %vm302_vm2 = vcmask (!%p423_p12), 261120  }
  0x46   : > { %552 = vset.pattern.permute.xlu0 (!%p423_p12), %v713_v6  ;;  %v219_v7 = vld [vmem:[%s966_s1] sm:$0xff] (!%p423_p12) }
  0x47   : > { %443 = vmatpush3.bf16.msra.mxu0 (!%p423_p12), %v442_v3  ;;  %225 = vperm.xlu0 (!%p423_p12), %552, %v222_v5  }
  0x4a   : > { %439 = vmatmul.mubr.msk.f32.vlgmr.msra.gmra.mrb[0].mxu0 (!%p423_p12), %vm228_vm1, %v219_v7 }
  0xc6   : > { %v226_v8 = vpop.permute.xlu0 %225 }
 0x11d   : > { %v298_v9 = vpop.f32.mrb[0].mxu0 }
 0x11e   : > { %v299_v10 = vadd.f32 %v298_v9, %v226_v8  ;;  %v440_v11 = vpop.f32.mrb[1].mxu0 }
 0x120   : > { %303 = vst.msk [vmem:[#allocation2] sm:$0xff] %vm302_vm2, %v299_v10 }
 0x121 PF: > { %vm305_vm3 = vcmask 261120   ;;  %s426_s28 = sshll.u32 %s693_s19, 2  ;;  %s324_s11 = sshll.u32 %s214_s6, 4  ;;  %s905_s11 = int_to_ptr.vmem [resolvable:$true] %s324_s11 }
 0x122   : > { %s320_s27 = sadd.s32 %s689_s18, %s426_s28  ;;  %s308_s24 = scalar_lea.sflag [#allocation5], %s212_s5 }
 0x123   : > { %s427_s15 = sshll.u32 %s320_s27, 7  ;;  %s583_s23 = scalar_lea.vmem %s905_s11, 128 }
 0x124   : > { %s322_s30 = scalar_lea.hbm %s968_s3, %s427_s15  ;;  %p584_p7 = scmp.ne.s32.totalorder %s905_s11, %s583_s23 }
 0x125   : > { %p978_p2 = scmp.ne.s32.totalorder %s974_s7, 0  ;;  %s714_s18 = smov [#allocation6]  }
 0x126   : > { %s587_s19 = sshll.u32 %s714_s18, 4  ;;  %s588_s19 = int_to_ptr.vmem [resolvable:$false] %s587_s19 }
 0x127   : > { %v304_v12 = vld [vmem:[#allocation2] sm:$0xff]  ;;  %p585_p4 = pnand %p584_p7, %p978_p2  ;;  %s589_s26 = scalar_lea.vmem %s588_s19, 256 }
 0x128   : > { %306 = vst.msk [vmem:[%s214_s6] sm:$0xff] %vm305_vm3, %v304_v12  ;;  %p590_p1 = scmp.lt.s32.totalorder %s905_s11, %s588_s19  ;;  %p591_p6 = scmp.lt.s32.totalorder %s589_s26, %s583_s23 }
 0x129   : > { %p586_p0 = pneg %p585_p4 }
 0x12a   : > { %p592_p9 = por %p591_p6, %p590_p1 }
 0x12c   : > { %p593_p3 = pnand %p592_p9, %p586_p0 }
 0x12e   : > { %596 = shalt.err (!%p593_p3)
}
 0x12f   : > { %s597_s6 = scalar_lea.hbm %s322_s30, 128  ;;  %s601_s27 = scalar_lea.hbm %s968_s3, 1024 }
 0x130   : > { %p598_p11 = scmp.ne.s32.totalorder %s322_s30, %s597_s6  ;;  %p602_p8 = scmp.lt.u32.totalorder %s322_s30, %s968_s3 }
 0x131   : > { %p603_p10 = scmp.lt.u32.totalorder %s601_s27, %s597_s6  ;;  %p605_p7 = scmp.lt.u32.totalorder %s597_s6, %s322_s30 }
 0x132   : > { %p599_p13 = pnand %p598_p11, %p978_p2 }
 0x133   : > { %p604_p12 = por %p603_p10, %p602_p8 }
 0x134   : > { %p600_p5 = pneg %p599_p13 }
 0x135   : > { %p606_p4 = por %p605_p7, %p604_p12 }
 0x137   : > { %p607_p0 = pnand %p606_p4, %p600_p5 }
 0x139   : > { %610 = shalt.err (!%p607_p0)
}
 0x13a   : > { %446 = dma.vmem_to_hbm [thread:$0]  (%p978_p2), %s905_s11, 128, %s322_s30, %s308_s24  }
 0x13b PF: > { %p457_p1 = scmp.ge.s32.totalorder %s705_s22, 2  ;;  %s336_s4 = sand.u32 1, %s665_s12  }
 0x13c   : > { %p979_p6 = scmp.ne.s32.totalorder %s975_s10, 0  ;;  %s337_s23 = scalar_lea.sflag [#allocation5], %s336_s4 }
 0x13e   : > { %p453_p9 = pnand %p457_p1, %p979_p6 }
 0x140   : > { %660 = dma.done.wait (!%p453_p9), %s337_s23, 128  }
 0x141   : > { %662 = vsyncadd (!%p453_p9), %s337_s23, 4294967168  ;;  %s19_s22 = sadd.s32 1, %s705_s22   ;;  %s980_s7 = sld [smem:[#allocation9_spill]] }
 0x142   : > { %p16_p3 = scmp.ge.s32.totalorder %s19_s22, 10   ;;  %s981_s12 = smov %s669_s13 }
 0x143   : > { %s982_s13 = smov %s673_s14  ;;  %s983_s14 = smov %s825_s9 }
 0x144   : > { %s984_s15 = smov %s681_s16  ;;  %s985_s16 = smov %s685_s17 }
 0x145   : > { %s986_s17 = smov %s822_s8  ;;  %s987_s18 = smov %s697_s20 }
 0x146   : > { %s988_s19 = smov %s701_s21  ;;  %s989_s20 = smov %s992_s25 }
 0x147   : > { %s990_s21 = smov %s980_s7  ;;  %18 = sbr.rel (!%p16_p3) target bundleno = 9 (0x9), region = 81 }
 0x14e   :  { %342 = vsyncpa [#allocation4], 1 }
 0x14f   :  { %344 = vsyncpa [#allocation4 + $0x1], 1 }
 0x150   :  { %345 = vsyncpa [#allocation5], 1 }
 0x151   :  { %347 = vsyncpa [#allocation5 + $0x1], 1 }

</bundles_post_ra>
